<compile_context>
chip_gen: v5e
topology: v5e:2x2
jax: 0.10.0
libtpu: 0.0.40
codegen_flags: <defaults>
</compile_context>

<pallas_src>
from functools import partial

import jax
import jax.numpy as jnp
from jax.experimental import pallas as pl
from jax.experimental.pallas import tpu as pltpu


# ---------------------------------------------------------------------------
# Kernel 1: elementwise Bayesian parameter sampling
#   weight = W_mu + eps * softplus(W_rho), bias = bias_mu + eps * softplus(bias_rho)
# ---------------------------------------------------------------------------
def _softplus(x):
    # numerically safe softplus: max(x, 0) + log1p(exp(-|x|))
    return jnp.maximum(x, 0.0) + jnp.log1p(jnp.exp(-jnp.abs(x)))


def sample_params_kernel(w_mu_ref, w_rho_ref, w_eps_ref,
                         b_mu_ref, b_rho_ref, b_eps_ref,
                         w_out_ref, b_out_ref):
    w_out_ref[...] = w_mu_ref[...] + w_eps_ref[...] * _softplus(w_rho_ref[...])
    b_out_ref[...] = b_mu_ref[...] + b_eps_ref[...] * _softplus(b_rho_ref[...])


# ---------------------------------------------------------------------------
# Kernel 2: direct conv2d, one image per grid step.
#   - pad into VMEM scratch
#   - build im2col patch matrix (KH*KW*Cin, OH*OW) in VMEM scratch
#   - single MXU matmul: (Cout, KH*KW*Cin) @ (KH*KW*Cin, OH*OW)
#   - lane-dense store of (Cout, OH*OW)
# ---------------------------------------------------------------------------
def conv_kernel(x_ref, w_ref, b_ref, o_ref, xpad_ref, patch_ref, *,
                H, W, KH, KW, OH, OW, Cin, Cout, stride, padding, dilation):
    # Zero-padded input tile in VMEM (no HBM pad pass in the wrapper).
    if padding > 0:
        xpad_ref[...] = jnp.zeros_like(xpad_ref)
        xpad_ref[:, padding:padding + H, padding:padding + W] = x_ref[0]
    else:
        xpad_ref[...] = x_ref[0]
    x = xpad_ref[...]                                      # (Cin, Hp, Wp)

    # im2col: row block t = kh*KW + kw holds that tap's Cin channels; spatial
    # output positions (OH*OW) are the lane dimension.
    for kh in range(KH):                                   # static unroll over taps
        for kw in range(KW):
            t = kh * KW + kw
            sl = jax.lax.slice(
                x,
                (0, kh * dilation, kw * dilation),
                (Cin,
                 kh * dilation + (OH - 1) * stride + 1,
                 kw * dilation + (OW - 1) * stride + 1),
                (1, stride, stride))                       # (Cin, OH, OW)
            patch_ref[t * Cin:(t + 1) * Cin, :] = sl.reshape(Cin, OH * OW)

    # One fat contraction on the MXU, f32 accumulation.
    acc = jnp.dot(w_ref[...], patch_ref[...],
                  preferred_element_type=jnp.float32)      # (Cout, OH*OW)
    acc = acc + b_ref[...].astype(jnp.float32)             # (Cout, 1) broadcast
    o_ref[0] = acc.astype(o_ref.dtype)                     # lane-dense store


# ---------------------------------------------------------------------------
# Wrapper: BayesianConv2d.forward (forward_nolrt)
# ---------------------------------------------------------------------------
def bayesian_conv2d_forward(x, W_mu, W_rho, bias_mu, bias_rho, key,
                            *, stride=1, padding=0, dilation=1, sample=True):
    N, Cin, H, W = x.shape
    Cout, _, KH, KW = W_mu.shape

    if sample:
        kw_eps, kb_eps = jax.random.split(key)
        W_eps = jax.random.normal(kw_eps, W_mu.shape, W_mu.dtype)
        b_eps = jax.random.normal(kb_eps, bias_mu.shape, bias_mu.dtype)

        Wm2 = W_mu.reshape(Cout, Cin * KH * KW)
        Wr2 = W_rho.reshape(Cout, Cin * KH * KW)
        We2 = W_eps.reshape(Cout, Cin * KH * KW)
        bm2 = bias_mu.reshape(1, Cout)
        br2 = bias_rho.reshape(1, Cout)
        be2 = b_eps.reshape(1, Cout)

        weight2, bias2 = pl.pallas_call(
            sample_params_kernel,
            out_shape=(jax.ShapeDtypeStruct(Wm2.shape, Wm2.dtype),
                       jax.ShapeDtypeStruct(bm2.shape, bm2.dtype)),
        )(Wm2, Wr2, We2, bm2, br2, be2)
        weight = weight2.reshape(Cout, Cin, KH, KW)
        bias = bias2.reshape(Cout)
    else:
        weight = W_mu
        bias = bias_mu

    Hp, Wp = H + 2 * padding, W + 2 * padding
    OH = (Hp - dilation * (KH - 1) - 1) // stride + 1
    OW = (Wp - dilation * (KW - 1) - 1) // stride + 1

    # Weight laid out (Cout, KH*KW*Cin) matching the kernel's im2col row order
    # (kh, kw, cin).  Tiny tensor -> negligible wrapper-side transpose.
    w2 = jnp.transpose(weight, (0, 2, 3, 1)).reshape(Cout, KH * KW * Cin)
    b2 = bias.reshape(Cout, 1)

    kern = partial(conv_kernel, H=H, W=W, KH=KH, KW=KW, OH=OH, OW=OW,
                   Cin=Cin, Cout=Cout, stride=stride, padding=padding,
                   dilation=dilation)

    out = pl.pallas_call(
        kern,
        out_shape=jax.ShapeDtypeStruct((N, Cout, OH * OW), x.dtype),
        grid=(N,),
        in_specs=[
            pl.BlockSpec((1, Cin, H, W), lambda n: (n, 0, 0, 0)),
            pl.BlockSpec((Cout, KH * KW * Cin), lambda n: (0, 0)),
            pl.BlockSpec((Cout, 1), lambda n: (0, 0)),
        ],
        out_specs=pl.BlockSpec((1, Cout, OH * OW), lambda n: (n, 0, 0)),
        scratch_shapes=[
            pltpu.VMEM((Cin, Hp, Wp), x.dtype),             # padded image tile
            pltpu.VMEM((KH * KW * Cin, OH * OW), jnp.float32),  # im2col patches
        ],
        compiler_params=pltpu.CompilerParams(dimension_semantics=("parallel",)),
    )(x, w2, b2)

    out_nchw = out.reshape(N, Cout, OH, OW)                 # free reshape, no transpose
    return out_nchw, weight, bias


if __name__ == "__main__":
    key = jax.random.PRNGKey(0)
    kx, kwm, kwr, kbm, kbr, keps = jax.random.split(key, 6)

    # Small, module-consistent shapes
    N, Cin, H, W = 2, 4, 16, 16
    Cout, K = 8, 3
    stride, padding, dilation = 1, 1, 1

    x = jax.random.normal(kx, (N, Cin, H, W), jnp.float32)
    # reset_parameters(): W_mu ~ N(0, 0.1), W_rho ~ N(-5, 0.1), same for bias
    W_mu = 0.0 + 0.1 * jax.random.normal(kwm, (Cout, Cin, K, K), jnp.float32)
    W_rho = -5.0 + 0.1 * jax.random.normal(kwr, (Cout, Cin, K, K), jnp.float32)
    bias_mu = 0.0 + 0.1 * jax.random.normal(kbm, (Cout,), jnp.float32)
    bias_rho = -5.0 + 0.1 * jax.random.normal(kbr, (Cout,), jnp.float32)

    out, weight, bias = bayesian_conv2d_forward(
        x, W_mu, W_rho, bias_mu, bias_rho, keps,
        stride=stride, padding=padding, dilation=dilation, sample=True)
    out = jax.block_until_ready(out)

    # Self-check against pure-JAX conv on the same sampled weights.
    ref = jax.lax.conv_general_dilated(
        x, weight, window_strides=(stride, stride),
        padding=((padding, padding), (padding, padding)),
        rhs_dilation=(dilation, dilation),
        dimension_numbers=("NCHW", "OIHW", "NCHW")) + bias[None, :, None, None]
    assert out.shape == (N, Cout, H, W), out.shape
    assert jnp.allclose(out, ref, atol=1e-4, rtol=1e-4), float(jnp.abs(out - ref).max())

    # softplus sanity vs reference formulation
    ref_w = W_mu + (weight - W_mu)  # weight already checked via conv; check sigma path shape
    assert weight.shape == W_mu.shape and bias.shape == bias_mu.shape

    print("KERNEL_OK")
</pallas_src>

<mosaic_0001>
module attributes {stable_mosaic.version = 11 : i64} {
  func.func @sample_params_kernel(%arg0: memref<8x36xf32, #tpu.memory_space<vmem>>, %arg1: memref<8x36xf32, #tpu.memory_space<vmem>>, %arg2: memref<8x36xf32, #tpu.memory_space<vmem>>, %arg3: memref<1x8xf32, #tpu.memory_space<vmem>>, %arg4: memref<1x8xf32, #tpu.memory_space<vmem>>, %arg5: memref<1x8xf32, #tpu.memory_space<vmem>>, %arg6: memref<8x36xf32, #tpu.memory_space<vmem>>, %arg7: memref<1x8xf32, #tpu.memory_space<vmem>>) attributes {dimension_semantics = [], scalar_prefetch = 0 : i64, scratch_operands = 0 : i64, tpu.core_type = #tpu.core_type<tc>} {
    %c0 = arith.constant 0 : index
    %c0_0 = arith.constant 0 : index
    %0 = vector.load %arg0[%c0, %c0_0] : memref<8x36xf32, #tpu.memory_space<vmem>>, vector<8x36xf32>
    %c0_1 = arith.constant 0 : index
    %c0_2 = arith.constant 0 : index
    %1 = vector.load %arg2[%c0_1, %c0_2] : memref<8x36xf32, #tpu.memory_space<vmem>>, vector<8x36xf32>
    %c0_3 = arith.constant 0 : index
    %c0_4 = arith.constant 0 : index
    %2 = vector.load %arg1[%c0_3, %c0_4] : memref<8x36xf32, #tpu.memory_space<vmem>>, vector<8x36xf32>
    %cst = arith.constant 0.000000e+00 : f32
    %3 = vector.broadcast %cst : f32 to vector<8x36xf32>
    %4 = arith.maximumf %2, %3 : vector<8x36xf32>
    %5 = math.absf %2 : vector<8x36xf32>
    %cst_5 = arith.constant 0.000000e+00 : f32
    %6 = vector.broadcast %cst_5 : f32 to vector<8x36xf32>
    %7 = arith.subf %6, %5 : vector<8x36xf32>
    %8 = math.exp %7 : vector<8x36xf32>
    %9 = math.log1p %8 : vector<8x36xf32>
    %10 = arith.addf %4, %9 : vector<8x36xf32>
    %11 = arith.mulf %1, %10 : vector<8x36xf32>
    %12 = arith.addf %0, %11 : vector<8x36xf32>
    %c0_6 = arith.constant 0 : index
    %c0_7 = arith.constant 0 : index
    %13 = vector.load %arg6[%c0_6, %c0_7] : memref<8x36xf32, #tpu.memory_space<vmem>>, vector<8x36xf32>
    tpu.vector_store %arg6[%c0_6, %c0_7], %12 {strides = array<i32>} : memref<8x36xf32, #tpu.memory_space<vmem>>, vector<8x36xf32>,
    %c0_8 = arith.constant 0 : index
    %c0_9 = arith.constant 0 : index
    %14 = vector.load %arg3[%c0_8, %c0_9] : memref<1x8xf32, #tpu.memory_space<vmem>>, vector<1x8xf32>
    %c0_10 = arith.constant 0 : index
    %c0_11 = arith.constant 0 : index
    %15 = vector.load %arg5[%c0_10, %c0_11] : memref<1x8xf32, #tpu.memory_space<vmem>>, vector<1x8xf32>
    %c0_12 = arith.constant 0 : index
    %c0_13 = arith.constant 0 : index
    %16 = vector.load %arg4[%c0_12, %c0_13] : memref<1x8xf32, #tpu.memory_space<vmem>>, vector<1x8xf32>
    %cst_14 = arith.constant 0.000000e+00 : f32
    %17 = vector.broadcast %cst_14 : f32 to vector<1x8xf32>
    %18 = arith.maximumf %16, %17 : vector<1x8xf32>
    %19 = math.absf %16 : vector<1x8xf32>
    %cst_15 = arith.constant 0.000000e+00 : f32
    %20 = vector.broadcast %cst_15 : f32 to vector<1x8xf32>
    %21 = arith.subf %20, %19 : vector<1x8xf32>
    %22 = math.exp %21 : vector<1x8xf32>
    %23 = math.log1p %22 : vector<1x8xf32>
    %24 = arith.addf %18, %23 : vector<1x8xf32>
    %25 = arith.mulf %15, %24 : vector<1x8xf32>
    %26 = arith.addf %14, %25 : vector<1x8xf32>
    %c0_16 = arith.constant 0 : index
    %c0_17 = arith.constant 0 : index
    %27 = vector.load %arg7[%c0_16, %c0_17] : memref<1x8xf32, #tpu.memory_space<vmem>>, vector<1x8xf32>
    tpu.vector_store %arg7[%c0_16, %c0_17], %26 {strides = array<i32>} : memref<1x8xf32, #tpu.memory_space<vmem>>, vector<1x8xf32>,
    return
  }
}

</mosaic_0001>

<bundles_post_ra>
// kernel: tpu_custom_call.1
= control target key start
LH: loop header
LB: loop body
LE: loop exit
PB: predicated region body
PF: predicated region fallthrough
CT: control target
= control target key end

     0   :  { %13 = vsyncpa [#allocation3], 0  ;;  %s356_s0 = inlined_call_operand.hbm [shape: f32[8,36], index: 0, kind: input, shape index: {}]   ;;  %s357_s1 = inlined_call_operand.hbm [shape: f32[8,36], index: 1, kind: input, shape index: {}]   ;;  %s358_s2 = inlined_call_operand.hbm [shape: f32[8,36], index: 2, kind: input, shape index: {}]   ;;  %s359_s3 = inlined_call_operand.vmem [shape: f32[1,8], index: 3, kind: input, shape index: {}]   ;;  %s360_s4 = inlined_call_operand.vmem [shape: f32[1,8], index: 4, kind: input, shape index: {}]   ;;  %s361_s5 = inlined_call_operand.vmem [shape: f32[1,8], index: 5, kind: input, shape index: {}]   ;;  %s362_s6 = inlined_call_operand.hbm [shape: f32[8,36], index: 6, kind: output, shape index: {0}]   ;;  %s363_s7 = inlined_call_operand.hbm [shape: f32[1,8], index: 7, kind: output, shape index: {1}]  }
   0x1   :  { %14 = vsyncpa [#allocation6], 0 }
   0x2   :  { %15 = vsyncpa [#allocation4], 0  ;;  %s33_s26 = sshll.u32 %s357_s1, 4  ;;  %s34_s26 = int_to_ptr.hbm [resolvable:$true] %s33_s26 }
   0x3   :  { %16 = vsyncpa [#allocation10], 0  ;;  %s287_s27 = smov [#allocation5]   ;;  %s22_s8 = sshll.u32 %s356_s0, 4  ;;  %s23_s8 = int_to_ptr.hbm [resolvable:$true] %s22_s8 }
   0x4   :  { %s35_s28 = sshll.u32 %s287_s27, 4  ;;  %s288_s9 = smov [#allocation2]   ;;  %s36_s28 = int_to_ptr.vmem [resolvable:$true] %s35_s28 }
   0x5   :  { %38 = dma.hbm_to_vmem [thread:$0]  %s34_s26, 128, %s36_s28, [#allocation6]  }
   0x6   :  { %s24_s10 = sshll.u32 %s288_s9, 4  ;;  %s44_s13 = sshll.u32 %s358_s2, 4  ;;  %s25_s10 = int_to_ptr.vmem [resolvable:$true] %s24_s10  ;;  %s45_s13 = int_to_ptr.hbm [resolvable:$true] %s44_s13 }
   0x7   :  { %27 = dma.hbm_to_vmem [thread:$0]  %s23_s8, 128, %s25_s10, [#allocation3]  }
   0x8   :  { %s289_s1 = smov [#allocation7]  }
   0x9   :  { %s46_s14 = sshll.u32 %s289_s1, 4  ;;  %s47_s14 = int_to_ptr.vmem [resolvable:$true] %s46_s14 }
   0xa   :  { %49 = dma.hbm_to_vmem [thread:$0]  %s45_s13, 128, %s47_s14, [#allocation6]  }
   0xb   :  { %279 = dma.done.wait [#allocation3], 128  }
   0xc   :  { %280 = vsyncadd [#allocation3], 4294967168 }
   0xd   :  { %281 = dma.done.wait [#allocation6], 256  }
   0xe   :  { %282 = vsyncadd [#allocation6], 4294967040  ;;  %v70_v0 = vld [vmem:[#allocation5] sm:$0xff]  ;;  %v92_v2 = vld [vmem:[%s360_s4] sm:$0x1]  ;;  %s290_s16 = smov [#allocation8]  }
   0xf   :  { %v72_v1 = vand.u32 2147483647, %v70_v0  ;;  %v94_v4 = vand.u32 2147483647, %v92_v2  ;;  %v71_v20 = vmax.f32 %v70_v0, 0.0  ;;  %v93_v24 = vmax.f32 %v92_v2, 0.0 }
  0x10   :  { %v69_v25 = vld [vmem:[#allocation7] sm:$0xff]  ;;  %v68_v29 = vld [vmem:[#allocation2] sm:$0xff]  ;;  %s117_s17 = sshll.u32 %s290_s16, 4  ;;  %s119_s20 = sshll.u32 %s362_s6, 4  ;;  %vm88_vm2 = vcmask 293888   ;;  %vm110_vm3 = vcmask 57344   ;;  %s118_s17 = int_to_ptr.vmem [resolvable:$true] %s117_s17  ;;  %s120_s20 = int_to_ptr.hbm [resolvable:$true] %s119_s20 }
  0x11   :  { %v73_v3 = vsub.f32 0.0, %v72_v1  ;;  %v95_v6 = vsub.f32 0.0, %v94_v4  ;;  %v91_v30 = vld [vmem:[%s361_s5] sm:$0x1]  ;;  %s291_s23 = smov [#allocation9]   ;;  %s130_s5 = sshll.u32 %s363_s7, 4  ;;  %s131_s5 = int_to_ptr.hbm [resolvable:$true] %s130_s5 }
  0x12   :  { %v90_v34 = vld [vmem:[%s359_s3] sm:$0x1]  ;;  %s128_s24 = sshll.u32 %s291_s23, 4  ;;  %s129_s24 = int_to_ptr.vmem [resolvable:$true] %s128_s24 }
  0x13   :  { %v74_v5 = vmul.f32 1.442695, %v73_v3  ;;  %v96_v7 = vmul.f32 1.442695, %v95_v6 }
  0x15   :  { %151 = vpow2.f32 %v74_v5 }
  0x16   :  { %153 = vpow2.f32 %v96_v7 }
  0x1b   :  { %v152_v8 = vpop.eup %151 }
  0x1c   :  { %v76_v9 = vadd.f32 1.0, %v152_v8  ;;  %v79_v10 = vmul.f32 -0.5, %v152_v8  ;;  %v154_v11 = vpop.eup %153  ;;  %v82_v15 = vand.u32 2147483647, %v152_v8 }
  0x1d   :  { %v98_v12 = vadd.f32 1.0, %v154_v11  ;;  %v101_v14 = vmul.f32 -0.5, %v154_v11  ;;  %v104_v17 = vand.u32 2147483647, %v154_v11 }
  0x1e   :  { %155 = vlog2.f32 %v76_v9  ;;  %v80_v13 = vadd.f32 1.0, %v79_v10  ;;  %vm83_vm0 = vcmp.lt.f32.partialorder %v82_v15, 0.0004427343 }
  0x1f   :  { %157 = vlog2.f32 %v98_v12  ;;  %v102_v16 = vadd.f32 1.0, %v101_v14  ;;  %vm105_vm1 = vcmp.lt.f32.partialorder %v104_v17, 0.0004427343 }
  0x20   :  { %v81_v18 = vmul.f32 %v152_v8, %v80_v13 }
  0x21   :  { %v103_v22 = vmul.f32 %v154_v11, %v102_v16 }
  0x24   :  { %v156_v19 = vpop.eup %155 }
  0x25   :  { %v78_v21 = vmul.f32 0.6931472, %v156_v19  ;;  %v158_v23 = vpop.eup %157 }
  0x26   :  { %v100_v27 = vmul.f32 0.6931472, %v158_v23 }
  0x27   :  { %v84_v26 = vsel %vm83_vm0, %v81_v18, %v78_v21 }
  0x28   :  { %v85_v28 = vadd.f32 %v84_v26, %v71_v20  ;;  %v106_v31 = vsel %vm105_vm1, %v103_v22, %v100_v27 }
  0x29   :  { %v107_v33 = vadd.f32 %v106_v31, %v93_v24 }
  0x2a   :  { %v86_v32 = vmul.f32 %v85_v28, %v69_v25 }
  0x2b   :  { %v108_v36 = vmul.f32 %v107_v33, %v91_v30 }
  0x2c   :  { %v87_v35 = vadd.f32 %v86_v32, %v68_v29 }
  0x2d   :  { %v109_v37 = vadd.f32 %v108_v36, %v90_v34 }
  0x2e   :  { %89 = vst.msk [vmem:[#allocation8] sm:$0xff] %vm88_vm2, %v87_v35 }
  0x2f   :  { %122 = dma.vmem_to_hbm [thread:$0]  %s118_s17, 128, %s120_s20, [#allocation4]   ;;  %111 = vst.msk [vmem:[#allocation9] sm:$0x1] %vm110_vm3, %v109_v37 }
  0x30   :  { %133 = dma.vmem_to_hbm [thread:$0]  %s129_s24, 16, %s131_s5, [#allocation10]  }
  0x31   :  { %283 = dma.done.wait [#allocation4], 128  }
  0x32   :  { %284 = vsyncadd [#allocation4], 4294967168 }
  0x33   :  { %285 = dma.done.wait [#allocation10], 16  }
  0x34   :  { %286 = vsyncadd [#allocation10], 4294967280 }
  0x35   :  { %142 = vsyncpa [#allocation3], 1 }
  0x36   :  { %143 = vsyncpa [#allocation6], 1 }
  0x37   :  { %144 = vsyncpa [#allocation4], 1 }
  0x38   :  { %145 = vsyncpa [#allocation10], 1 }

</bundles_post_ra>
